<compile_context>
chip_gen: v7x
topology: tpu7x:2x2x1
jax: 0.10.0
libtpu: 0.0.40
codegen_flags: <defaults>
</compile_context>

<pallas_src>
import functools

import jax
import jax.numpy as jnp
from jax.experimental import pallas as pl
from jax.experimental.pallas import tpu as pltpu

BN_EPS = 1e-5
OUT_PAD = 8  # lane width of the f32 output slab (>= n_out=2)


def _residual_fcnn_kernel(x_ref, wA_ref, w2_ref, wB_ref, wo_ref, b_ref, out_ref):
    # Static shapes derived from the refs.
    n1, n2 = w2_ref.shape          # h0, h1
    nA = wA_ref.shape[1]           # h0 + h1
    n3 = wo_ref.shape[0]           # h2
    nB = wB_ref.shape[1]           # 2 * h2
    n_out_pad = out_ref.shape[1]   # OUT_PAD (8)

    # x arrives in its HBM dtype (f32); cast to bf16 in-register for the MXU.
    x = x_ref[...].astype(jnp.bfloat16)        # (tb, input_size)

    # --- fused (fc1 ∘ bn1) and residual1: both consume x --------------------
    yA = jnp.dot(x, wA_ref[...], preferred_element_type=jnp.float32)
    yA = yA + b_ref[0:1, :nA]
    h1 = jnp.maximum(yA[:, :n1], 0.0)          # relu1 (dropout1 == identity)
    res2 = yA[:, n1:nA]                        # residual1(x)

    # --- fc2 ∘ bn2 (folded) --------------------------------------------------
    y2 = jnp.dot(h1.astype(jnp.bfloat16), w2_ref[...],
                 preferred_element_type=jnp.float32)
    h2 = jnp.maximum(y2 + b_ref[1:2, :n2], 0.0) + res2   # relu2 + residual

    # --- fused (fc3 ∘ bn3) and residual2: both consume h2 --------------------
    h2b = h2.astype(jnp.bfloat16)
    yB = jnp.dot(h2b, wB_ref[...], preferred_element_type=jnp.float32)
    yB = yB + b_ref[2:3, :nB]
    h3 = jnp.maximum(yB[:, :n3], 0.0) + yB[:, n3:nB]      # relu3 + residual

    # --- output head (8-lane f32 slab -> 16x less HBM writeback) -------------
    out_ref[...] = (
        jnp.dot(h3.astype(jnp.bfloat16), wo_ref[...],
                preferred_element_type=jnp.float32)
        + b_ref[3:4, :n_out_pad]
    )


def _fold_bn(w, b, g, be, m, v):
    """Fold eval-mode BatchNorm into the preceding Linear (w:(in,H), rest (1,H))."""
    scale = g * jax.lax.rsqrt(v + BN_EPS)
    return w * scale, (b - m) * scale + be


def prepare_params(p):
    """Fold BN, fuse shared-input weights, pack biases, cast weights to bf16."""
    w1, b1 = _fold_bn(p["w1"], p["b1"], p["g1"], p["be1"], p["m1"], p["v1"])
    w2, b2 = _fold_bn(p["w2"], p["b2"], p["g2"], p["be2"], p["m2"], p["v2"])
    w3, b3 = _fold_bn(p["w3"], p["b3"], p["g3"], p["be3"], p["m3"], p["v3"])

    # Fuse matmuls that share an input (wider N => better MXU utilization).
    wA = jnp.concatenate([w1, p["wr1"]], axis=1)   # (in, h0 + h1)
    bA = jnp.concatenate([b1, p["br1"]], axis=1)   # (1,  h0 + h1)
    wB = jnp.concatenate([w3, p["wr2"]], axis=1)   # (h1, 2*h2)
    bB = jnp.concatenate([b3, p["br2"]], axis=1)   # (1,  2*h2)

    n_out = p["wo"].shape[1]
    wo = jnp.pad(p["wo"], ((0, 0), (0, OUT_PAD - n_out)))   # (h2, 8)
    bo = jnp.pad(p["bo"], ((0, 0), (0, OUT_PAD - n_out)))   # (1, 8)

    # Pack all bias rows into one lane-padded (4, BW) f32 array.
    bw = max(bA.shape[1], b2.shape[1], bB.shape[1], 128)
    bw = ((bw + 127) // 128) * 128

    def pad_row(b):
        return jnp.pad(b, ((0, 0), (0, bw - b.shape[1])))

    bias = jnp.concatenate(
        [pad_row(bA), pad_row(b2), pad_row(bB), pad_row(bo)], axis=0
    ).astype(jnp.float32)

    return dict(
        wA=wA.astype(jnp.bfloat16),
        w2=w2.astype(jnp.bfloat16),
        wB=wB.astype(jnp.bfloat16),
        wo=wo.astype(jnp.bfloat16),
        bias=bias,
    )


@functools.partial(jax.jit, static_argnames=("n_out", "batch_tile"))
def residual_fcnn_forward(x, prep, *, n_out=2, batch_tile=1024):
    """ResidualFCNN eval-mode forward via a fused Pallas TPU kernel.

    x: [B, input_size] float32 (cast to bf16 inside the kernel).
    prep: output of prepare_params().
    """
    B, F = x.shape

    # Batch-tile selection:
    #   * Large B: 1024-row tiles (amortizes ~0.35 us per grid step, fills MXU).
    #   * Moderate B (<= tile, >= 64): split into >= 2 grid steps so v7x's two
    #     TensorCores both get work on the "parallel" axis (rows rounded to 16).
    #   * Small B: one exact tile, rows rounded to 8 (f32 sublane tile; the
    #     bf16 cast happens inside the kernel, so no 16-row bf16 block exists
    #     in HBM).
    tb = batch_tile
    if B <= tb:
        if B >= 64:
            tb = ((pl.cdiv(B, 2) + 15) // 16) * 16
        else:
            tb = max(8, ((B + 7) // 8) * 8)
    n_tiles = pl.cdiv(B, tb)

    wA, w2, wB, wo, bias = prep["wA"], prep["w2"], prep["wB"], prep["wo"], prep["bias"]

    # VMEM budget from the actual tile footprint (+headroom), not a hardcoded
    # 64 MiB (which is the entire physical VMEM of a v7x TensorCore).
    weight_bytes = sum(int(a.size) * a.dtype.itemsize for a in (wA, w2, wB, wo, bias))
    x_blk = tb * F * x.dtype.itemsize
    out_blk = tb * OUT_PAD * 4
    inter_bytes = tb * 512 * 4          # f32 intermediates (yA,h1,res2,y2,h2,yB,h3)
    est = 2 * x_blk + 2 * out_blk + 2 * weight_bytes + inter_bytes
    vmem_limit = int(min(32 * 1024 * 1024, max(16 * 1024 * 1024, 2 * est)))

    # No wrapper-side pad / cast: the grid is cdiv(B, tb) on the unpadded
    # array; the edge block's out-of-range rows only produce output rows past
    # B, which Pallas masks on store (no cross-row reductions in the kernel).
    x_spec = pl.BlockSpec((tb, F), lambda i: (i, 0))

    def full(p):
        return pl.BlockSpec(p.shape, lambda i: (0, 0))

    out_spec = pl.BlockSpec((tb, OUT_PAD), lambda i: (i, 0))

    out = pl.pallas_call(
        _residual_fcnn_kernel,
        out_shape=jax.ShapeDtypeStruct((B, OUT_PAD), jnp.float32),
        grid_spec=pltpu.PrefetchScalarGridSpec(
            num_scalar_prefetch=0,
            grid=(n_tiles,),
            in_specs=[x_spec, full(wA), full(w2), full(wB), full(wo), full(bias)],
            out_specs=out_spec,
        ),
        compiler_params=pltpu.CompilerParams(
            dimension_semantics=("parallel",),
            vmem_limit_bytes=vmem_limit,
        ),
    )(x, wA, w2, wB, wo, bias)

    return out[:, :n_out]


def init_params(key, input_size, hidden_sizes):
    """Deterministic synthetic parameters matching nn.Module shapes.

    Linear weights stored transposed: (in_features, out_features).
    BatchNorm gamma/beta/running_mean/running_var stored as (1, H).
    """
    h0, h1, h2 = hidden_sizes
    keys = jax.random.split(key, 32)
    ki = iter(keys)

    def lin(in_f, out_f):
        w = jax.random.normal(next(ki), (in_f, out_f), jnp.float32) * 0.05
        b = jax.random.normal(next(ki), (1, out_f), jnp.float32) * 0.05
        return w, b

    def bn(h):
        g = 1.0 + 0.1 * jax.random.normal(next(ki), (1, h), jnp.float32)
        be = 0.1 * jax.random.normal(next(ki), (1, h), jnp.float32)
        m = 0.1 * jax.random.normal(next(ki), (1, h), jnp.float32)
        v = jnp.abs(jax.random.normal(next(ki), (1, h), jnp.float32)) + 0.5
        return g, be, m, v

    w1, b1 = lin(input_size, h0)
    g1, be1, m1, v1 = bn(h0)
    w2, b2 = lin(h0, h1)
    g2, be2, m2, v2 = bn(h1)
    w3, b3 = lin(h1, h2)
    g3, be3, m3, v3 = bn(h2)
    wr1, br1 = lin(input_size, h1)
    wr2, br2 = lin(h1, h2)
    wo, bo = lin(h2, 2)

    return dict(
        w1=w1, b1=b1, g1=g1, be1=be1, m1=m1, v1=v1,
        w2=w2, b2=b2, g2=g2, be2=be2, m2=m2, v2=v2,
        w3=w3, b3=b3, g3=g3, be3=be3, m3=m3, v3=v3,
        wr1=wr1, br1=br1, wr2=wr2, br2=br2,
        wo=wo, bo=bo,
    )


def reference_forward(x, p):
    """Plain-JAX f32 reference (mirrors PyTorch eval-mode forward, unfolded)."""
    def bn(h, g, be, m, v):
        return (h - m) * jax.lax.rsqrt(v + BN_EPS) * g + be

    h1 = jnp.maximum(bn(x @ p["w1"] + p["b1"], p["g1"], p["be1"], p["m1"], p["v1"]), 0.0)
    h2 = jnp.maximum(bn(h1 @ p["w2"] + p["b2"], p["g2"], p["be2"], p["m2"], p["v2"]), 0.0)
    h2 = h2 + (x @ p["wr1"] + p["br1"])
    h3 = jnp.maximum(bn(h2 @ p["w3"] + p["b3"], p["g3"], p["be3"], p["m3"], p["v3"]), 0.0)
    h3 = h3 + (h2 @ p["wr2"] + p["br2"])
    return h3 @ p["wo"] + p["bo"]


if __name__ == "__main__":
    key = jax.random.PRNGKey(0)
    k_x, k_x2, k_x3, k_p = jax.random.split(key, 4)

    input_size = 32
    hidden_sizes = (64, 64, 32)

    params = init_params(k_p, input_size, hidden_sizes)
    prep = prepare_params(params)

    # Small batch: single exact tile (tb == 8).
    x_small = jax.random.normal(k_x, (8, input_size), jnp.float32)
    out_small = jax.block_until_ready(residual_fcnn_forward(x_small, prep))
    ref_small = reference_forward(x_small, params)
    assert out_small.shape == (8, 2)
    assert jnp.allclose(out_small, ref_small, atol=3e-2, rtol=3e-2)

    # Larger batch: split into two exact 192-row tiles (v7x megacore path).
    x_big = jax.random.normal(k_x2, (384, input_size), jnp.float32)
    out_big = jax.block_until_ready(residual_fcnn_forward(x_big, prep))
    ref_big = reference_forward(x_big, params)
    assert out_big.shape == (384, 2)
    assert jnp.allclose(out_big, ref_big, atol=3e-2, rtol=3e-2)

    # Non-divisible batch: two tiles with a masked partial edge block
    # (no wrapper-side padding).
    x_edge = jax.random.normal(k_x3, (200, input_size), jnp.float32)
    out_edge = jax.block_until_ready(residual_fcnn_forward(x_edge, prep))
    ref_edge = reference_forward(x_edge, params)
    assert out_edge.shape == (200, 2)
    assert jnp.allclose(out_edge, ref_edge, atol=3e-2, rtol=3e-2)

    print("KERNEL_OK")
</pallas_src>

<mosaic_0001>
module attributes {stable_mosaic.version = 11 : i64} {
  func.func @_residual_fcnn_kernel(%arg0: i32, %arg1: memref<8x32xf32, #tpu.memory_space<vmem>>, %arg2: memref<32x128xbf16, #tpu.memory_space<vmem>>, %arg3: memref<64x64xbf16, #tpu.memory_space<vmem>>, %arg4: memref<64x64xbf16, #tpu.memory_space<vmem>>, %arg5: memref<32x8xbf16, #tpu.memory_space<vmem>>, %arg6: memref<4x128xf32, #tpu.memory_space<vmem>>, %arg7: memref<8x8xf32, #tpu.memory_space<vmem>>) attributes {dimension_semantics = [#tpu.dimension_semantics<parallel>], iteration_bounds = array<i64: 1>, scalar_prefetch = 0 : i64, scratch_operands = 0 : i64, tpu.core_type = #tpu.core_type<tc>, window_params = [{transform_indices = @transform_0, window_bounds = array<i64: 8, 32>}, {pipeline_mode = #tpu.pipeline_mode<synchronous>, transform_indices = @transform_1, window_bounds = array<i64: 32, 128>}, {pipeline_mode = #tpu.pipeline_mode<synchronous>, transform_indices = @transform_2, window_bounds = array<i64: 64, 64>}, {pipeline_mode = #tpu.pipeline_mode<synchronous>, transform_indices = @transform_3, window_bounds = array<i64: 64, 64>}, {pipeline_mode = #tpu.pipeline_mode<synchronous>, transform_indices = @transform_4, window_bounds = array<i64: 32, 8>}, {pipeline_mode = #tpu.pipeline_mode<synchronous>, transform_indices = @transform_5, window_bounds = array<i64: 4, 128>}, {transform_indices = @transform_6, window_bounds = array<i64: 8, 8>}]} {
    %c0 = arith.constant 0 : index
    %c0_0 = arith.constant 0 : index
    %0 = vector.load %arg1[%c0, %c0_0] : memref<8x32xf32, #tpu.memory_space<vmem>>, vector<8x32xf32>
    %1 = arith.truncf %0 : vector<8x32xf32> to vector<8x32xbf16>
    %c0_1 = arith.constant 0 : index
    %c0_2 = arith.constant 0 : index
    %2 = vector.load %arg2[%c0_1, %c0_2] : memref<32x128xbf16, #tpu.memory_space<vmem>>, vector<32x128xbf16>
    %cst = arith.constant dense<0.000000e+00> : vector<8x128xf32>
    %3 = tpu.matmul %1, %2, %cst {dimension_numbers = #tpu.dot_dimension_numbers<[1], [0], [0], [1], [0, 0, 1, 1], [], []>} : vector<8x32xbf16>, vector<32x128xbf16>, vector<8x128xf32> -> vector<8x128xf32>
    %c0_3 = arith.constant 0 : index
    %c0_4 = arith.constant 0 : index
    %4 = vector.load %arg6[%c0_3, %c0_4] : memref<4x128xf32, #tpu.memory_space<vmem>>, vector<1x128xf32>
    %5 = vector.broadcast %4 : vector<1x128xf32> to vector<8x128xf32>
    %6 = arith.addf %3, %5 : vector<8x128xf32>
    %7 = vector.extract_strided_slice %6 {offsets = [0, 0], sizes = [8, 64], strides = [1, 1]} : vector<8x128xf32> to vector<8x64xf32>
    %cst_5 = arith.constant 0.000000e+00 : f32
    %8 = vector.broadcast %cst_5 : f32 to vector<8x64xf32>
    %9 = arith.maximumf %7, %8 : vector<8x64xf32>
    %10 = vector.extract_strided_slice %6 {offsets = [0, 64], sizes = [8, 64], strides = [1, 1]} : vector<8x128xf32> to vector<8x64xf32>
    %11 = arith.truncf %9 : vector<8x64xf32> to vector<8x64xbf16>
    %c0_6 = arith.constant 0 : index
    %c0_7 = arith.constant 0 : index
    %12 = vector.load %arg3[%c0_6, %c0_7] : memref<64x64xbf16, #tpu.memory_space<vmem>>, vector<64x64xbf16>
    %cst_8 = arith.constant dense<0.000000e+00> : vector<8x64xf32>
    %13 = tpu.matmul %11, %12, %cst_8 {dimension_numbers = #tpu.dot_dimension_numbers<[1], [0], [0], [1], [0, 0, 1, 1], [], []>} : vector<8x64xbf16>, vector<64x64xbf16>, vector<8x64xf32> -> vector<8x64xf32>
    %c1 = arith.constant 1 : index
    %c0_9 = arith.constant 0 : index
    %14 = vector.load %arg6[%c1, %c0_9] : memref<4x128xf32, #tpu.memory_space<vmem>>, vector<1x64xf32>
    %15 = vector.broadcast %14 : vector<1x64xf32> to vector<8x64xf32>
    %16 = arith.addf %13, %15 : vector<8x64xf32>
    %cst_10 = arith.constant 0.000000e+00 : f32
    %17 = vector.broadcast %cst_10 : f32 to vector<8x64xf32>
    %18 = arith.maximumf %16, %17 : vector<8x64xf32>
    %19 = arith.addf %18, %10 : vector<8x64xf32>
    %20 = arith.truncf %19 : vector<8x64xf32> to vector<8x64xbf16>
    %c0_11 = arith.constant 0 : index
    %c0_12 = arith.constant 0 : index
    %21 = vector.load %arg4[%c0_11, %c0_12] : memref<64x64xbf16, #tpu.memory_space<vmem>>, vector<64x64xbf16>
    %cst_13 = arith.constant dense<0.000000e+00> : vector<8x64xf32>
    %22 = tpu.matmul %20, %21, %cst_13 {dimension_numbers = #tpu.dot_dimension_numbers<[1], [0], [0], [1], [0, 0, 1, 1], [], []>} : vector<8x64xbf16>, vector<64x64xbf16>, vector<8x64xf32> -> vector<8x64xf32>
    %c2 = arith.constant 2 : index
    %c0_14 = arith.constant 0 : index
    %23 = vector.load %arg6[%c2, %c0_14] : memref<4x128xf32, #tpu.memory_space<vmem>>, vector<1x64xf32>
    %24 = vector.broadcast %23 : vector<1x64xf32> to vector<8x64xf32>
    %25 = arith.addf %22, %24 : vector<8x64xf32>
    %26 = vector.extract_strided_slice %25 {offsets = [0, 0], sizes = [8, 32], strides = [1, 1]} : vector<8x64xf32> to vector<8x32xf32>
    %cst_15 = arith.constant 0.000000e+00 : f32
    %27 = vector.broadcast %cst_15 : f32 to vector<8x32xf32>
    %28 = arith.maximumf %26, %27 : vector<8x32xf32>
    %29 = vector.extract_strided_slice %25 {offsets = [0, 32], sizes = [8, 32], strides = [1, 1]} : vector<8x64xf32> to vector<8x32xf32>
    %30 = arith.addf %28, %29 : vector<8x32xf32>
    %31 = arith.truncf %30 : vector<8x32xf32> to vector<8x32xbf16>
    %c0_16 = arith.constant 0 : index
    %c0_17 = arith.constant 0 : index
    %32 = vector.load %arg5[%c0_16, %c0_17] : memref<32x8xbf16, #tpu.memory_space<vmem>>, vector<32x8xbf16>
    %cst_18 = arith.constant dense<0.000000e+00> : vector<8x8xf32>
    %33 = tpu.matmul %31, %32, %cst_18 {dimension_numbers = #tpu.dot_dimension_numbers<[1], [0], [0], [1], [0, 0, 1, 1], [], []>} : vector<8x32xbf16>, vector<32x8xbf16>, vector<8x8xf32> -> vector<8x8xf32>
    %c3 = arith.constant 3 : index
    %c0_19 = arith.constant 0 : index
    %34 = vector.load %arg6[%c3, %c0_19] : memref<4x128xf32, #tpu.memory_space<vmem>>, vector<1x8xf32>
    %35 = vector.broadcast %34 : vector<1x8xf32> to vector<8x8xf32>
    %36 = arith.addf %33, %35 : vector<8x8xf32>
    %c0_20 = arith.constant 0 : index
    %c0_21 = arith.constant 0 : index
    %37 = vector.load %arg7[%c0_20, %c0_21] : memref<8x8xf32, #tpu.memory_space<vmem>>, vector<8x8xf32>
    tpu.vector_store %arg7[%c0_20, %c0_21], %36 {strides = array<i32>} : memref<8x8xf32, #tpu.memory_space<vmem>>, vector<8x8xf32>,
    return
  }
  func.func @transform_0(%arg0: i32) -> (i32, i32) {
    %c0_i32 = arith.constant 0 : i32
    %c0_i32_0 = arith.constant 0 : i32
    return %arg0, %c0_i32 : i32, i32
  }
  func.func @transform_1(%arg0: i32) -> (i32, i32) {
    %c0_i32 = arith.constant 0 : i32
    %c0_i32_0 = arith.constant 0 : i32
    %c0_i32_1 = arith.constant 0 : i32
    return %c0_i32, %c0_i32_0 : i32, i32
  }
  func.func @transform_2(%arg0: i32) -> (i32, i32) {
    %c0_i32 = arith.constant 0 : i32
    %c0_i32_0 = arith.constant 0 : i32
    %c0_i32_1 = arith.constant 0 : i32
    return %c0_i32, %c0_i32_0 : i32, i32
  }
  func.func @transform_3(%arg0: i32) -> (i32, i32) {
    %c0_i32 = arith.constant 0 : i32
    %c0_i32_0 = arith.constant 0 : i32
    %c0_i32_1 = arith.constant 0 : i32
    return %c0_i32, %c0_i32_0 : i32, i32
  }
  func.func @transform_4(%arg0: i32) -> (i32, i32) {
    %c0_i32 = arith.constant 0 : i32
    %c0_i32_0 = arith.constant 0 : i32
    %c0_i32_1 = arith.constant 0 : i32
    return %c0_i32, %c0_i32_0 : i32, i32
  }
  func.func @transform_5(%arg0: i32) -> (i32, i32) {
    %c0_i32 = arith.constant 0 : i32
    %c0_i32_0 = arith.constant 0 : i32
    %c0_i32_1 = arith.constant 0 : i32
    return %c0_i32, %c0_i32_0 : i32, i32
  }
  func.func @transform_6(%arg0: i32) -> (i32, i32) {
    %c0_i32 = arith.constant 0 : i32
    %c0_i32_0 = arith.constant 0 : i32
    return %arg0, %c0_i32 : i32, i32
  }
}

</mosaic_0001>

<bundles_post_ra>
// kernel: residual_fcnn_forward.1
= control target key start
LH: loop header
LB: loop body
LE: loop exit
PB: predicated region body
PF: predicated region fallthrough
CT: control target
= control target key end

     0   :  { %11 = vsyncpa [#allocation3], 0  ;;  %s727_s0 = inlined_call_operand.hbm [shape: f32[8,32], index: 0, kind: input, shape index: {}]   ;;  %s728_s1 = inlined_call_operand.hbm [shape: bf16[32,128], index: 1, kind: input, shape index: {}]   ;;  %s729_s2 = inlined_call_operand.hbm [shape: bf16[64,64], index: 2, kind: input, shape index: {}]   ;;  %s730_s3 = inlined_call_operand.vmem [shape: bf16[64,64], index: 3, kind: input, shape index: {}]   ;;  %s731_s4 = inlined_call_operand.vmem [shape: bf16[32,8], index: 4, kind: input, shape index: {}]   ;;  %s732_s5 = inlined_call_operand.hbm [shape: f32[4,128], index: 5, kind: input, shape index: {}]   ;;  %s733_s6 = inlined_call_operand.vmem [shape: f32[8,8], index: 6, kind: output, shape index: {}]  }
   0x1   :  { %12 = vsyncpa [#allocation5], 0 }
   0x2   :  { %13 = vsyncpa [#allocation8], 0  ;;  %s583_s21 = smov [#allocation4]   ;;  %s489_s25 = scalar_lea.hbm %s728_s1, 256 }
   0x3   :  { %s29_s22 = sshll.u32 %s583_s21, 4  ;;  %p490_p0 = scmp.ne.s32.totalorder %s728_s1, %s489_s25  ;;  %s30_s22 = int_to_ptr.vmem [resolvable:$true] %s29_s22 }
   0x4   :  { %p493_p1 = scmp.lt.u32.totalorder %s489_s25, %s728_s1 }
   0x6   :  { %p495_p2 = pnand %p493_p1, %p490_p0 }
   0x8   :  { %498 = shalt.err (!%p495_p2)
}
   0x9   :  { %s499_s30 = scalar_lea.vmem %s30_s22, 256  ;;  %p504_p4 = scmp.lt.s32.totalorder %s30_s22, %s30_s22 }
   0xa   :  { %p500_p3 = scmp.ne.s32.totalorder %s30_s22, %s499_s30  ;;  %p505_p5 = scmp.lt.s32.totalorder %s499_s30, %s499_s30 }
   0xc   :  { %p506_p6 = por %p505_p5, %p504_p4 }
   0xe   :  { %p507_p7 = pnand %p506_p6, %p500_p3 }
  0x10   :  { %510 = shalt.err (!%p507_p7)
}
  0x11   :  { %s584_s7 = smov 64   ;;  %s585_s8 = smov 4  }
  0x12   :  { %35 = dma.hbm_to_vmem [thread:$0]  %s728_s1, 256, %s30_s22, [#allocation5], %s584_s7, %s584_s7, %s585_s8  }
  0x13   :  { %s586_s11 = smov [#allocation2]   ;;  %s587_s13 = smov [#allocation6]  }
  0x14   :  { %s20_s12 = sshll.u32 %s586_s11, 4  ;;  %s41_s14 = sshll.u32 %s587_s13, 4  ;;  %s21_s12 = int_to_ptr.vmem [resolvable:$true] %s20_s12  ;;  %s42_s14 = int_to_ptr.vmem [resolvable:$true] %s41_s14 }
  0x15   :  { %s511_s17 = scalar_lea.hbm %s727_s0, 128 }
  0x16   :  { %p512_p8 = scmp.ne.s32.totalorder %s727_s0, %s511_s17  ;;  %p515_p9 = scmp.lt.u32.totalorder %s511_s17, %s727_s0 }
  0x18   :  { %p517_p10 = pnand %p515_p9, %p512_p8 }
  0x1a   :  { %520 = shalt.err (!%p517_p10)
}
  0x1b   :  { %s521_s1 = scalar_lea.vmem %s21_s12, 128  ;;  %p526_p12 = scmp.lt.s32.totalorder %s21_s12, %s21_s12 }
  0x1c   :  { %p522_p11 = scmp.ne.s32.totalorder %s21_s12, %s521_s1  ;;  %p527_p13 = scmp.lt.s32.totalorder %s521_s1, %s521_s1 }
  0x1e   :  { %p528_p0 = por %p527_p13, %p526_p12 }
  0x20   :  { %p529_p1 = pnand %p528_p0, %p522_p11 }
  0x22   :  { %532 = shalt.err (!%p529_p1)
}
  0x23   :  { %23 = dma.hbm_to_vmem [thread:$0]  %s727_s0, 128, %s21_s12, [#allocation3]  }
  0x24   :  { %s533_s26 = scalar_lea.hbm %s729_s2, 512 }
  0x25   :  { %p534_p2 = scmp.ne.s32.totalorder %s729_s2, %s533_s26  ;;  %p537_p3 = scmp.lt.u32.totalorder %s533_s26, %s729_s2 }
  0x27   :  { %p539_p4 = pnand %p537_p3, %p534_p2 }
  0x29   :  { %542 = shalt.err (!%p539_p4)
}
  0x2a   :  { %s543_s9 = scalar_lea.vmem %s42_s14, 512  ;;  %p548_p6 = scmp.lt.s32.totalorder %s42_s14, %s42_s14 }
  0x2b   :  { %p544_p5 = scmp.ne.s32.totalorder %s42_s14, %s543_s9  ;;  %p549_p7 = scmp.lt.s32.totalorder %s543_s9, %s543_s9 }
  0x2d   :  { %p550_p8 = por %p549_p7, %p548_p6 }
  0x2f   :  { %p551_p9 = pnand %p550_p8, %p544_p5 }
  0x31   :  { %554 = shalt.err (!%p551_p9)
}
  0x32   :  { %47 = dma.hbm_to_vmem [thread:$0]  %s729_s2, 512, %s42_s14, [#allocation5], %s584_s7, %s584_s7, %s585_s8  }
  0x33   :  { %s588_s11 = smov [#allocation7]   ;;  %s555_s16 = scalar_lea.hbm %s732_s5, 64 }
  0x34   :  { %s58_s12 = sshll.u32 %s588_s11, 4  ;;  %p556_p10 = scmp.ne.s32.totalorder %s732_s5, %s555_s16  ;;  %s59_s12 = int_to_ptr.vmem [resolvable:$true] %s58_s12 }
  0x35   :  { %p559_p11 = scmp.lt.u32.totalorder %s555_s16, %s732_s5 }
  0x37   :  { %p561_p12 = pnand %p559_p11, %p556_p10 }
  0x39   :  { %564 = shalt.err (!%p561_p12)
}
  0x3a   :  { %s565_s21 = scalar_lea.vmem %s59_s12, 64  ;;  %p570_p0 = scmp.lt.s32.totalorder %s59_s12, %s59_s12 }
  0x3b   :  { %p566_p13 = scmp.ne.s32.totalorder %s59_s12, %s565_s21  ;;  %p571_p1 = scmp.lt.s32.totalorder %s565_s21, %s565_s21 }
  0x3d   :  { %p572_p2 = por %p571_p1, %p570_p0 }
  0x3f   :  { %p573_p3 = pnand %p572_p2, %p566_p13 }
  0x41   :  { %576 = shalt.err (!%p573_p3)
}
  0x42   :  { %61 = dma.hbm_to_vmem [thread:$0]  %s732_s5, 64, %s59_s12, [#allocation8]  }
  0x43   :  { %577 = dma.done.wait [#allocation3], 128  }
  0x44   :  { %578 = vsyncadd [#allocation3], 4294967168 }
  0x45   :  { %579 = dma.done.wait [#allocation5], 768  }
  0x46   :  { %580 = vsyncadd [#allocation5], 4294966528 }
  0x47   :  { %581 = dma.done.wait [#allocation8], 64  }
  0x48   :  { %582 = vsyncadd [#allocation8], 4294967232  ;;  %v589_v0 = vmov 0.0   ;;  %vm590_vm0 = vmmov 0   ;;  %v477_v1 = vld [vmem:[#allocation4] sm:$0xff]   ;;  %v478_v2 = vld [vmem:[#allocation4 + $0x8] sm:$0xff]  }
  0x49   :  { %428 = vmatprep.subr.bf16.mxu0 %v589_v0  ;;  %432 = vmatprep.mubr.msk.bf16.mxu0 %vm590_vm0, %v589_v0  ;;  %v75_v3 = vld [vmem:[#allocation2] sm:$0xff]  ;;  %v479_v4 = vld [vmem:[#allocation6] sm:$0xff]   ;;  %vm98_vm1 = vcmask 261120   ;;  %v481_v7 = vld [vmem:[#allocation6 + $0x10] sm:$0xff]   ;;  %vm181_vm2 = vcmask 523264   ;;  %s591_s29 = smov 96  }
  0x4a   :  { %436 = vmatprep.subr.bf16.mxu1 %v589_v0  ;;  %444 = vmatprep.mubr.msk.bf16.mxu1 %vm590_vm0, %v589_v0  ;;  %v480_v5 = vld [vmem:[#allocation6 + $0x8] sm:$0xff]   ;;  %v76_v6 = vpack.c.bf16 %v75_v3, %v75_v3  ;;  %v482_v8 = vld [vmem:[#allocation6 + $0x18] sm:$0xff]   ;;  %v484_v10 = vld [vmem:[%s730_s3 + $0x8] sm:$0xff]   ;;  %vm383_vm3 = vcmask 64512  }
  0x4b   :  { %429 = vmatpush3.bf16.msra.mxu0 %v477_v1  ;;  %437 = vmatpush3.bf16.msra.mxu1 %v479_v4  ;;  %v483_v9 = vld [vmem:[%s730_s3] sm:$0xff]   ;;  %v392_v11 = vld [vmem:[#allocation7] ss:$0 sm:$0xff]  ;;  %v485_v19 = vld [vmem:[%s730_s3 + $0x10] sm:$0xff]  }
  0x4c   :  { %430 = vmatprep.subr.bf16.mxu0 %v589_v0  ;;  %438 = vmatprep.subr.bf16.mxu1 %v589_v0  ;;  %v486_v20 = vld [vmem:[%s730_s3 + $0x18] sm:$0xff]   ;;  %v487_v31 = vld [vmem:[%s731_s4] sm:$0xff]   ;;  %v488_v32 = vld [vmem:[%s731_s4 + $0x8] sm:$0xff]  }
  0x4d   :  { %v396_v21 = vld [vmem:[#allocation7 + $0x1] ss:$0 sm:$0xff]  ;;  %v402_v33 = vld [vmem:[#allocation7 + $0x2] ss:$0 sm:$0xff]  ;;  %v408_v43 = vld [vmem:[#allocation7 + $0x3] ss:$0 sm:$0xff] }
  0x4f   :  { %431 = vmatpush3.bf16.msra.mxu0 %v478_v2  ;;  %439 = vmatpush3.bf16.msra.mxu1 %v480_v5 }
  0x50   :  { %448 = vmatprep.subr.bf16.mxu0 %v589_v0  ;;  %440 = vmatprep.subr.bf16.mxu1 %v589_v0 }
  0x52   :  { %433 = vmatmul.mubr.msk.bf16.vlgmr.msra.gmra.mrb[0].mxu0 %vm98_vm1, %v76_v6 }
  0x53   :  { %456 = vmatprep.mubr.msk.bf16.mxu0 %vm590_vm0, %v589_v0  ;;  %441 = vmatpush3.bf16.msra.mxu1 %v481_v7 }
  0x54   :  { %442 = vmatprep.subr.bf16.mxu1 %v589_v0  ;;  %449 = vmatpush3.bf16.msra.mxu0 %v483_v9 }
  0x55   :  { %450 = vmatprep.subr.bf16.mxu0 %v589_v0 }
  0x57   :  { %443 = vmatpush3.bf16.msra.mxu1 %v482_v8 }
  0x58   :  { %460 = vmatprep.subr.bf16.mxu1 %v589_v0  ;;  %451 = vmatpush3.bf16.msra.mxu0 %v484_v10 }
  0x59   :  { %452 = vmatprep.subr.bf16.mxu0 %v589_v0 }
  0x5c   :  { %453 = vmatpush3.bf16.msra.mxu0 %v485_v19 }
  0x5d   :  { %454 = vmatprep.subr.bf16.mxu0 %v589_v0 }
  0x60   :  { %455 = vmatpush3.bf16.msra.mxu0 %v486_v20 }
 0x125   :  { %v136_v12 = vpop.f32.mrb[0].mxu0 }
 0x126   :  { %v137_v13 = vadd.f32 %v392_v11, %v136_v12  ;;  %v434_v14 = vpop.f32.mrb[1].mxu0 }
 0x127   :  { %v139_v15 = vpop.f32.mrb[2].mxu0 }
 0x128   :  { %v142_v16 = vmax.f32 %v137_v13, 0.0  ;;  %227 = vrot.lane.b32.xlu0 %v137_v13, %s584_s7  ;;  %v435_v17 = vpop.f32.mrb[3].mxu0 }
 0x12a   :  { %v143_v18 = vpack.c.bf16 %v142_v16, %v142_v16 }
 0x12c   :  { %445 = vmatmul.mubr.msk.bf16.vlgmr.msra.gmra.mrb[0].mxu1 %vm181_vm2, %v143_v18 }
 0x12d   :  { %464 = vmatprep.mubr.msk.bf16.mxu1 %vm590_vm0, %v589_v0  ;;  %461 = vmatpush3.bf16.msra.mxu1 %v487_v31 }
 0x12e   :  { %462 = vmatprep.subr.bf16.mxu1 %v589_v0 }
 0x131   :  { %463 = vmatpush3.bf16.msra.mxu1 %v488_v32 }
 0x19a   :  { %v228_v28 = vpop.permute.xlu0 %227 }
 0x1ff   :  { %v219_v22 = vpop.f32.mrb[0].mxu1 }
 0x200   :  { %v220_v23 = vadd.f32 %v396_v21, %v219_v22  ;;  %v446_v24 = vpop.f32.mrb[1].mxu1 }
 0x201   :  { %v222_v25 = vpop.f32.mrb[2].mxu1 }
 0x202   :  { %v225_v26 = vmax.f32 %v220_v23, 0.0  ;;  %v447_v27 = vpop.f32.mrb[3].mxu1 }
 0x204   :  { %v230_v29 = vadd.f32 %v228_v28, %v225_v26 }
 0x206   :  { %v231_v30 = vpack.c.bf16 %v230_v29, %v230_v29 }
 0x208   :  { %457 = vmatmul.mubr.msk.bf16.vlgmr.msra.gmra.mrb[4].mxu0 %vm181_vm2, %v231_v30 }
 0x2db   :  { %v306_v34 = vpop.f32.mrb[4].mxu0 }
 0x2dc   :  { %v307_v35 = vadd.f32 %v402_v33, %v306_v34  ;;  %v458_v36 = vpop.f32.mrb[5].mxu0 }
 0x2dd   :  { %v309_v37 = vpop.f32.mrb[6].mxu0 }
 0x2de   :  { %314 = vrot.lane.b32.xlu0 %v307_v35, %s591_s29  ;;  %v459_v38 = vpop.f32.mrb[7].mxu0  ;;  %v312_v39 = vmax.f32 %v307_v35, 0.0 }
 0x350   :  { %v315_v40 = vpop.permute.xlu0 %314 }
 0x351   :  { %v317_v41 = vadd.f32 %v315_v40, %v312_v39 }
 0x353   :  { %v318_v42 = vpack.c.bf16 %v317_v41, %v317_v41 }
 0x355   :  { %465 = vmatmul.mubr.msk.bf16.vlgmr.msra.gmra.mrb[4].mxu1 %vm98_vm1, %v318_v42 }
 0x428   :  { %v377_v44 = vpop.f32.mrb[4].mxu1 }
 0x429   :  { %v378_v45 = vadd.f32 %v408_v43, %v377_v44  ;;  %v466_v46 = vpop.f32.mrb[5].mxu1 }
 0x42a   :  { %v380_v47 = vpop.f32.mrb[6].mxu1 }
 0x42b   :  { %384 = vst.msk [vmem:[%s733_s6] sm:$0xff] %vm383_vm3, %v378_v45  ;;  %v467_v48 = vpop.f32.mrb[7].mxu1 }
 0x42c   :  { %389 = vsyncpa [#allocation3], 1 }
 0x42d   :  { %390 = vsyncpa [#allocation5], 1 }
 0x42e   :  { %391 = vsyncpa [#allocation8], 1 }

</bundles_post_ra>
